<compile_context>
chip_gen: v7x
topology: tpu7x:2x2x1
jax: 0.10.0
libtpu: 0.0.40
codegen_flags: <defaults>
</compile_context>

<pallas_src>
import functools

import jax
import jax.numpy as jnp
from jax.experimental import pallas as pl
from jax.experimental.pallas import tpu as pltpu


def _label_smooth_kernel(pred_ref, tgt_ref, out_ref, *, positive, negative,
                         tile_n, n_total, mask_rows):
    # Inputs may be bf16 (halves HBM bytes); do all softmax math in f32.
    pred = pred_ref[...].astype(jnp.float32)           # (TILE_N, C)
    tgt = tgt_ref[...]                                  # (TILE_N, 1) int32

    # Numerically stable log-sum-exp along the class (lane) axis.
    m = jnp.max(pred, axis=1, keepdims=True)            # (TILE_N, 1)
    shifted = pred - m                                   # (TILE_N, C)
    lse = jnp.log(jnp.sum(jnp.exp(shifted), axis=1, keepdims=True))  # (TILE_N,1)

    # Fused weighted reduction (uses negative*C + positive - negative == 1):
    #   per_row = lse - sum_c( w_c * shifted_c ),  w_c = pos at target else neg
    col = jax.lax.broadcasted_iota(jnp.int32, shifted.shape, 1)
    w = jnp.where(col == tgt, jnp.float32(positive), jnp.float32(negative))
    weighted = jnp.sum(w * shifted, axis=1, keepdims=True)           # (TILE_N,1)
    per_row = lse - weighted                                          # (TILE_N,1)

    if mask_rows:
        # Ragged last tile: rows past N hold stale/garbage data.  Use a SELECT
        # (not a multiply) so NaN/inf in those rows cannot propagate.
        row0 = pl.program_id(0) * tile_n
        row_idx = row0 + jax.lax.broadcasted_iota(jnp.int32, (tile_n, 1), 0)
        per_row = jnp.where(row_idx < n_total, per_row, 0.0)

    # One partial sum per tile; global mean is taken outside the kernel.
    out_ref[...] = jnp.sum(per_row, keepdims=True)


def _pick_vmem_limit():
    """Generation-aware scoped-VMEM limit (128 MiB phys on v5e/v6e, 64 MiB on
    v7x); leave headroom for Mosaic internal scratch."""
    try:
        phys = int(pltpu.get_tpu_info().vmem_capacity_bytes)
    except Exception:  # not on TPU / info unavailable -> conservative (v7x)
        phys = 64 * 1024 * 1024
    return min((phys * 3) // 4, 96 * 1024 * 1024)


def _choose_tile_n(n, c, itemsize, vmem_limit_bytes):
    """Biggest batch tile whose working set fits the scoped VMEM limit.
    Counts 2x double-buffered input rows plus ~3 full-width f32 temporaries
    (cast pred, shifted, weighted product) per row."""
    # Sublane packing multiple: 8 for 4-byte, 16 for bf16, 32 for int8/fp8.
    sub = max(8, 32 // max(1, itemsize))
    per_row = 2 * c * itemsize + 3 * c * 4 + 32
    usable = (vmem_limit_bytes * 4) // 5            # 80% of the scoped limit
    rows = usable // max(1, per_row)
    rows = min(rows, 4096)                          # keep per-step time sane
    rows = max(sub, (rows // sub) * sub)
    n_ceil = ((n + sub - 1) // sub) * sub
    return min(rows, n_ceil)


def label_smooth_loss(pred, target, num_classes=None, smoothing=0.0):
    """pred: (N, C) float32/bf16, target: (N,) int -> scalar float32 loss."""
    n, c = pred.shape
    if num_classes is None:
        num_classes = c
    eps = smoothing / num_classes
    negative = eps
    positive = 1.0 - smoothing + eps

    itemsize = jnp.dtype(pred.dtype).itemsize
    vmem_limit = _pick_vmem_limit()
    tile_n = _choose_tile_n(n, c, itemsize, vmem_limit)
    num_tiles = pl.cdiv(n, tile_n)

    # No host-side padding: Pallas handles the partial last block and the
    # kernel masks rows >= N.  Target as (N, 1) int32 so the lane dim is full.
    tgt2d = target.astype(jnp.int32).reshape(n, 1)

    kernel = functools.partial(
        _label_smooth_kernel, positive=positive, negative=negative,
        tile_n=tile_n, n_total=n, mask_rows=(n % tile_n != 0))

    partial_sums = pl.pallas_call(
        kernel,
        out_shape=jax.ShapeDtypeStruct((num_tiles, 1), jnp.float32),
        grid=(num_tiles,),
        in_specs=[
            pl.BlockSpec((tile_n, c), lambda i: (i, 0)),   # pred tile
            pl.BlockSpec((tile_n, 1), lambda i: (i, 0)),   # target tile
        ],
        # Distinct per-tile output blocks keep the batch axis "parallel"
        # (megacore sharding on v7x); the tiny (1,1) writeback is negligible
        # next to the (tile_n, C) input DMA.
        out_specs=pl.BlockSpec((1, 1), lambda i: (i, 0)),
        compiler_params=pltpu.CompilerParams(
            dimension_semantics=("parallel",),
            vmem_limit_bytes=vmem_limit,
        ),
    )(pred, tgt2d)

    # Final reduction + mean OUTSIDE the tiled loop: multiply once by 1/N.
    return jnp.sum(partial_sums) * jnp.float32(1.0 / n)


def _reference(pred, target, num_classes, smoothing):
    eps = smoothing / num_classes
    negative = eps
    positive = 1.0 - smoothing + eps
    logp = jax.nn.log_softmax(pred.astype(jnp.float32), axis=1)
    true_dist = jnp.full_like(logp, negative)
    true_dist = true_dist.at[jnp.arange(pred.shape[0]), target].set(positive)
    return jnp.mean(jnp.sum(-true_dist * logp, axis=1))


if __name__ == "__main__":
    key = jax.random.PRNGKey(0)
    # Small shapes; n deliberately NOT a multiple of the sublane/tile size so
    # the unpadded ragged-block + row-mask path is exercised; C is a multiple
    # of 128 so class tiles are lane-dense.
    n, num_classes = 6, 128
    smoothing = 0.1

    k_pred, k_tgt = jax.random.split(key)
    pred = jax.random.normal(k_pred, (n, num_classes), dtype=jnp.float32)
    target = jax.random.randint(k_tgt, (n,), 0, num_classes, dtype=jnp.int32)

    # f32 input path
    loss = jax.block_until_ready(
        label_smooth_loss(pred, target, num_classes, smoothing))
    ref = _reference(pred, target, num_classes, smoothing)
    assert jnp.allclose(loss, ref, atol=1e-4, rtol=1e-4), (loss, ref)

    # bf16 input path (half the HBM traffic; f32 math inside the kernel)
    pred_bf16 = pred.astype(jnp.bfloat16)
    loss_bf = jax.block_until_ready(
        label_smooth_loss(pred_bf16, target, num_classes, smoothing))
    ref_bf = _reference(pred_bf16.astype(jnp.float32), target,
                        num_classes, smoothing)
    assert jnp.allclose(loss_bf, ref_bf, atol=1e-3, rtol=1e-3), (loss_bf, ref_bf)

    print("KERNEL_OK")
</pallas_src>

<mosaic_0001>
module attributes {stable_mosaic.version = 11 : i64} {
  func.func @_label_smooth_kernel(%arg0: i32, %arg1: memref<8x128xf32, #tpu.memory_space<vmem>>, %arg2: memref<8x1xi32, #tpu.memory_space<vmem>>, %arg3: memref<1x1xf32, #tpu.memory_space<vmem>>) attributes {dimension_semantics = [#tpu.dimension_semantics<parallel>], iteration_bounds = array<i64: 1>, scalar_prefetch = 0 : i64, scratch_operands = 0 : i64, tpu.core_type = #tpu.core_type<tc>, window_params = [{transform_indices = @transform_0, window_bounds = array<i64: 8, 128>}, {transform_indices = @transform_1, window_bounds = array<i64: 8, 1>}, {transform_indices = @transform_2, window_bounds = array<i64: 1, 1>}]} {
    %c0 = arith.constant 0 : index
    %c0_0 = arith.constant 0 : index
    %0 = vector.load %arg1[%c0, %c0_0] : memref<8x128xf32, #tpu.memory_space<vmem>>, vector<8x128xf32>
    %c0_1 = arith.constant 0 : index
    %c0_2 = arith.constant 0 : index
    %1 = vector.load %arg2[%c0_1, %c0_2] : memref<8x1xi32, #tpu.memory_space<vmem>>, vector<8x1xi32>
    %cst = arith.constant dense<0xFF800000> : vector<8xf32>
    %2 = vector.multi_reduction <maximumf>, %0, %cst [1] : vector<8x128xf32> to vector<8xf32>
    %3 = vector.shape_cast %2 : vector<8xf32> to vector<8x1xf32>
    %4 = vector.broadcast %3 : vector<8x1xf32> to vector<8x128xf32>
    %5 = arith.subf %0, %4 : vector<8x128xf32>
    %6 = math.exp %5 : vector<8x128xf32>
    %cst_3 = arith.constant dense<0.000000e+00> : vector<8xf32>
    %7 = vector.multi_reduction <add>, %6, %cst_3 [1] : vector<8x128xf32> to vector<8xf32>
    %8 = vector.shape_cast %7 : vector<8xf32> to vector<8x1xf32>
    %9 = math.log %8 : vector<8x1xf32>
    %10 = tpu.iota {dimensions = array<i32: 1>} : vector<8x128xi32>
    %11 = vector.broadcast %1 : vector<8x1xi32> to vector<8x128xi32>
    %12 = arith.cmpi eq, %10, %11 : vector<8x128xi32>
    %cst_4 = arith.constant 0.900781273 : f32
    %cst_5 = arith.constant 7.812500e-04 : f32
    %13 = vector.broadcast %cst_4 : f32 to vector<8x128xf32>
    %14 = vector.broadcast %cst_5 : f32 to vector<8x128xf32>
    %15 = arith.select %12, %13, %14 : vector<8x128xi1>, vector<8x128xf32>
    %16 = arith.mulf %15, %5 : vector<8x128xf32>
    %cst_6 = arith.constant dense<0.000000e+00> : vector<8xf32>
    %17 = vector.multi_reduction <add>, %16, %cst_6 [1] : vector<8x128xf32> to vector<8xf32>
    %18 = vector.shape_cast %17 : vector<8xf32> to vector<8x1xf32>
    %19 = arith.subf %9, %18 : vector<8x1xf32>
    %c8_i32 = arith.constant 8 : i32
    %20 = arith.muli %arg0, %c8_i32 : i32
    %21 = tpu.iota {dimensions = array<i32: 0>} : vector<8x1xi32>
    %22 = vector.broadcast %20 : i32 to vector<8x1xi32>
    %23 = arith.addi %22, %21 : vector<8x1xi32>
    %c6_i32 = arith.constant 6 : i32
    %24 = vector.broadcast %c6_i32 : i32 to vector<8x1xi32>
    %25 = arith.cmpi slt, %23, %24 : vector<8x1xi32>
    %cst_7 = arith.constant 0.000000e+00 : f32
    %26 = vector.broadcast %cst_7 : f32 to vector<8x1xf32>
    %27 = arith.select %25, %19, %26 : vector<8x1xi1>, vector<8x1xf32>
    %28 = vector.shape_cast %27 : vector<8x1xf32> to vector<1x8x1xf32>
    %cst_8 = arith.constant dense<0.000000e+00> : vector<1xf32>
    %29 = vector.multi_reduction <add>, %28, %cst_8 [1, 2] : vector<1x8x1xf32> to vector<1xf32>
    %30 = vector.shape_cast %29 : vector<1xf32> to vector<1x1x1xf32>
    %31 = vector.extract %30[0, 0, 0] : f32 from vector<1x1x1xf32>
    %32 = vector.broadcast %31 : f32 to vector<1x1xf32>
    %c0_9 = arith.constant 0 : index
    %c0_10 = arith.constant 0 : index
    %33 = vector.load %arg3[%c0_9, %c0_10] : memref<1x1xf32, #tpu.memory_space<vmem>>, vector<1x1xf32>
    tpu.vector_store %arg3[%c0_9, %c0_10], %32 {strides = array<i32>} : memref<1x1xf32, #tpu.memory_space<vmem>>, vector<1x1xf32>,
    return
  }
  func.func @transform_0(%arg0: i32) -> (i32, i32) {
    %c0_i32 = arith.constant 0 : i32
    %c0_i32_0 = arith.constant 0 : i32
    return %arg0, %c0_i32 : i32, i32
  }
  func.func @transform_1(%arg0: i32) -> (i32, i32) {
    %c0_i32 = arith.constant 0 : i32
    %c0_i32_0 = arith.constant 0 : i32
    return %arg0, %c0_i32 : i32, i32
  }
  func.func @transform_2(%arg0: i32) -> (i32, i32) {
    %c0_i32 = arith.constant 0 : i32
    %c0_i32_0 = arith.constant 0 : i32
    return %arg0, %c0_i32 : i32, i32
  }
}

</mosaic_0001>

<bundles_post_ra>
// kernel: tpu_custom_call.1
= control target key start
LH: loop header
LB: loop body
LE: loop exit
PB: predicated region body
PF: predicated region fallthrough
CT: control target
= control target key end

     0   :  { %s139_s0 = inlined_call_operand.vmem [shape: f32[6,128], index: 0, kind: input, shape index: {}]   ;;  %s140_s1 = inlined_call_operand.vmem [shape: s32[6,1], index: 1, kind: input, shape index: {}]   ;;  %s141_s2 = inlined_call_operand.hbm [shape: f32[1,1], index: 2, kind: output, shape index: {}]  }
   0x1   :  { %v12_v0 = vld [vmem:[%s139_s0] sm:$0xff] }
   0x2   :  { %7 = vsyncpa [#allocation3], 0  ;;  %14 = vmax.xlane.f32.xlu0 %v12_v0  ;;  %v103_v1 = vmov 0   ;;  %v13_v2 = vld [vmem:[%s140_s1] sm:$0xff]  ;;  %v23_v6 = vlaneseq  ;;  %v104_v10 = vmov 0.00078125  }
   0x3   :  { %74 = vset.pattern.permute.xlu0 %v103_v1  ;;  %vm41_vm2 = vcmask 7168   ;;  %s105_s0 = smov [#allocation2]   ;;  %vm53_vm3 = vcmask 0  }
   0x4   :  { %v24_v7 = vand.u32 127, %v23_v6  ;;  %v36_v14 = vshrl.u32 %v23_v6, 7  ;;  %s61_s1 = sshll.u32 %s105_s0, 4  ;;  %s62_s1 = int_to_ptr.vmem [resolvable:$true] %s61_s1 }
   0x5   :  { %s79_s14 = scalar_lea.vmem %s62_s1, 16  ;;  %s83_s15 = scalar_lea.vmem %s62_s1, 32 }
   0x6   :  { %vm39_vm1 = vcmp.lt.s32.totalorder %v36_v14, 6  ;;  %p80_p0 = scmp.ne.s32.totalorder %s62_s1, %s79_s14  ;;  %p84_p1 = scmp.lt.s32.totalorder %s62_s1, %s62_s1 }
   0x7   :  { %p85_p2 = scmp.lt.s32.totalorder %s83_s15, %s79_s14 }
   0x9   :  { %p86_p3 = por %p85_p2, %p84_p1 }
   0xb   :  { %p87_p4 = pnand %p86_p3, %p80_p0 }
  0x18   :  { %26 = vperm.xlu0 %74, %v13_v2  }
  0x8f   :  { %v15_v3 = vpop.xlane.xlu0 %14 }
  0x90   :  { %v16_v4 = vsub.f32 %v12_v0, %v15_v3 }
  0x92   :  { %v17_v5 = vmul.f32 1.442695, %v16_v4 }
  0x94   :  { %75 = vpow2.f32 %v17_v5 }
  0x97   :  { %v27_v8 = vpop.permute.xlu0 %26 }
  0x98   :  { %vm28_vm0 = vcmp.eq.s32.totalorder %v24_v7, %v27_v8 }
  0x99   :  { %v29_v11 = vsel %vm28_vm0, 0.9007813, %v104_v10 }
  0x9a   :  { %v30_v12 = vmul.f32 %v29_v11, %v16_v4 }
  0x9e   :  { %v76_v9 = vpop.eup %75 }
  0x9f   :  { %19 = vadd.xlane.f32.xlu1 %v76_v9 }
  0xa3   :  { %31 = vadd.xlane.f32.xlu1 %v30_v12 }
 0x12c   :  { %v20_v13 = vpop.xlane.xlu1 %19 }
 0x12d   :  { %77 = vlog2.f32 %v20_v13 }
 0x130   :  { %v32_v17 = vpop.xlane.xlu1 %31 }
 0x137   :  { %v78_v15 = vpop.eup %77 }
 0x138   :  { %v22_v16 = vmul.f32 0.6931472, %v78_v15 }
 0x13a   :  { %v33_v18 = vsub.f32 %v22_v16, %v32_v17 }
 0x13c   :  { %v40_v19 = vsel %vm39_vm1, %v33_v18, 0.0 }
 0x13d   :  { %v42_v20 = vsel %vm41_vm2, %v40_v19, 0.0 }
 0x13e   :  { %43 = vadd.xlane.f32.xlu1 %v42_v20 }
 0x1cb   :  { %v44_v21 = vpop.xlane.xlu1 %43 }
 0x1cc   :  { %v45_v22 = vrot.slane %v44_v21, 4 }
 0x1ce   :  { %v46_v23 = vadd.f32 %v45_v22, %v44_v21 }
 0x1d0   :  { %v47_v24 = vrot.slane %v46_v23, 2 }
 0x1d2   :  { %v48_v25 = vadd.f32 %v47_v24, %v46_v23 }
 0x1d4   :  { %v49_v26 = vrot.slane %v48_v25, 1 }
 0x1d6   :  { %v50_v27 = vadd.f32 %v49_v26, %v48_v25 }
 0x1d8   :  { %69 = vpush %v50_v27 }
 0x209   :  { %s70_s13 = spop %69 }
 0x20a   :  { %v52_v28 = vstv %s70_s13 }
 0x20b   :  { %54 = vst.msk [vmem:[#allocation2] sm:$0x1] %vm53_vm3, %v52_v28 }
 0x20c   :  { %90 = shalt.err (!%p87_p4)
}
 0x20d   :  { %s91_s18 = scalar_lea.hbm %s141_s2, 16 }
 0x20e   :  { %p92_p5 = scmp.ne.s32.totalorder %s141_s2, %s91_s18  ;;  %p95_p6 = scmp.lt.u32.totalorder %s91_s18, %s141_s2 }
 0x210   :  { %p97_p7 = pnand %p95_p6, %p92_p5 }
 0x212   :  { %100 = shalt.err (!%p97_p7)
}
 0x213   :  { %64 = dma.vmem_to_hbm [thread:$0]  %s62_s1, 16, %s141_s2, [#allocation3]  }
 0x214   :  { %101 = dma.done.wait [#allocation3], 16  }
 0x215   :  { %102 = vsyncadd [#allocation3], 4294967280 }
 0x216   :  { %68 = vsyncpa [#allocation3], 1 }

</bundles_post_ra>
